<compile_context>
chip_gen: v7x
topology: tpu7x:2x2x1
jax: 0.10.0
libtpu: 0.0.40
codegen_flags: <defaults>
</compile_context>

<pallas_src>
import functools

import jax
import jax.numpy as jnp
from jax.experimental import pallas as pl
from jax.experimental.pallas import tpu as pltpu


def _round_up(x, m):
    return ((x + m - 1) // m) * m


def _sublane(dtype):
    # Sublane packing multiple: 8 for f32, 16 for bf16, 32 for int8/fp8.
    return max(8, 32 // jnp.dtype(dtype).itemsize)


def _lora_kernel(x_ref, wt_ref, xa_ref, bt_ref, *rest, has_bias):
    # x:  (tm, tk)            wt: (tk, tn)   [W pre-transposed to (in, out)]
    # xa: (tm, r)  = x @ A^T  bt: (r, tn)    [B^T pre-scaled by alpha/r]
    # bias (optional): (1, tn)
    # scratch: acc (tm, tn) f32
    if has_bias:
        bias_ref, o_ref, acc_ref = rest
    else:
        bias_ref = None
        o_ref, acc_ref = rest

    k = pl.program_id(2)

    @pl.when(k == 0)
    def _init():
        acc_ref[...] = jnp.zeros_like(acc_ref)

    # Base matmul: straight (tm,tk)@(tk,tn) MXU feed (no transposed RHS).
    acc_ref[...] += jnp.dot(x_ref[...], wt_ref[...],
                            preferred_element_type=jnp.float32)

    @pl.when(k == pl.num_programs(2) - 1)
    def _finalize():
        # LoRA up-projection in compute dtype, f32 accumulate (r is tiny).
        lora = jnp.dot(xa_ref[...], bt_ref[...],
                       preferred_element_type=jnp.float32)
        out = acc_ref[...] + lora
        if has_bias:
            out = out + bias_ref[...].astype(jnp.float32)
        o_ref[...] = out.astype(o_ref.dtype)


def prepare_frozen_params(weight, bias=None, *, tn=512, tk=1024,
                          compute_dtype=None):
    """One-time (parameter-load-time) prep of the frozen linear layer:
    transpose W to (in_dim, out_dim), pad to tile multiples, cast to the
    compute dtype. Do NOT call this on every forward."""
    out_dim, in_dim = weight.shape
    if compute_dtype is not None:
        weight = weight.astype(compute_dtype)
        if bias is not None:
            bias = bias.astype(compute_dtype)

    tn = min(tn, _round_up(out_dim, 128))
    tk = min(tk, _round_up(in_dim, 128))
    Np = _round_up(out_dim, tn)
    Kp = _round_up(in_dim, tk)

    wt = weight.T                                   # (in_dim, out_dim)
    if (Kp, Np) != (in_dim, out_dim):
        wt = jnp.pad(wt, ((0, Kp - in_dim), (0, Np - out_dim)))

    bias2d = None
    if bias is not None:
        bias2d = bias.reshape(1, out_dim)
        if Np != out_dim:
            bias2d = jnp.pad(bias2d, ((0, 0), (0, Np - out_dim)))

    return dict(weight_t=wt, bias2d=bias2d, out_dim=out_dim, in_dim=in_dim,
                tn=tn, tk=tk, Np=Np, Kp=Kp)


def lora_linear_prepared(x, prep, A, B, r, alpha, *, tm=256):
    """Forward using a prepared frozen weight. x: (..., in_dim);
    A: (r, in_dim); B: (out_dim, r)."""
    out_dim, in_dim = prep["out_dim"], prep["in_dim"]
    tn, tk, Np, Kp = prep["tn"], prep["tk"], prep["Np"], prep["Kp"]
    wt, bias2d = prep["weight_t"], prep["bias2d"]

    orig_shape = x.shape
    x2d = x.reshape(-1, in_dim)
    M = x2d.shape[0]
    dtype = x2d.dtype

    # dtype normalization happens here (wrapper), never inside the kernel.
    if wt.dtype != dtype:
        wt = wt.astype(dtype)
        bias2d = None if bias2d is None else bias2d.astype(dtype)

    tm = min(tm, _round_up(M, _sublane(dtype)))
    Mp = _round_up(M, tm)

    scale = float(alpha) / float(r)
    # Tiny LoRA down-projection, hoisted out of the kernel (enables a fully
    # parallel j axis / v7x megacore use for small M).
    xa = jnp.dot(x2d, A.T.astype(dtype),
                 preferred_element_type=jnp.float32).astype(dtype)
    # Fold alpha/r into the tiny B^T operand (scale applied in f32).
    bt = (B.astype(jnp.float32) * scale).T.astype(dtype)   # (r, out_dim)

    # Zero-pad activations (no-op for aligned shapes).
    if (Mp, Kp) != (M, in_dim):
        x2d = jnp.pad(x2d, ((0, Mp - M), (0, Kp - in_dim)))
    if Mp != M:
        xa = jnp.pad(xa, ((0, Mp - M), (0, 0)))
    if Np != out_dim:
        bt = jnp.pad(bt, ((0, 0), (0, Np - out_dim)))

    has_bias = bias2d is not None
    inputs = [x2d, wt, xa, bt]
    in_specs = [
        pl.BlockSpec((tm, tk), lambda i, j, k: (i, k)),   # x tile
        pl.BlockSpec((tk, tn), lambda i, j, k: (k, j)),   # W^T tile
        pl.BlockSpec((tm, r), lambda i, j, k: (i, 0)),    # xa: depends only on i
        pl.BlockSpec((r, tn), lambda i, j, k: (0, j)),    # B^T: depends only on j
    ]
    if has_bias:
        inputs.append(bias2d)
        in_specs.append(pl.BlockSpec((1, tn), lambda i, j, k: (0, j)))

    kernel = functools.partial(_lora_kernel, has_bias=has_bias)

    out2d = pl.pallas_call(
        kernel,
        out_shape=jax.ShapeDtypeStruct((Mp, Np), dtype),
        grid_spec=pltpu.PrefetchScalarGridSpec(
            num_scalar_prefetch=0,
            grid=(Mp // tm, Np // tn, Kp // tk),
            in_specs=in_specs,
            out_specs=pl.BlockSpec((tm, tn), lambda i, j, k: (i, j)),
            scratch_shapes=[pltpu.VMEM((tm, tn), jnp.float32)],
        ),
        compiler_params=pltpu.CompilerParams(
            dimension_semantics=("parallel", "parallel", "arbitrary"),
            vmem_limit_bytes=48 * 1024 * 1024,
        ),
    )(*inputs)

    out2d = out2d[:M, :out_dim]
    return out2d.reshape(*orig_shape[:-1], out_dim)


def lora_linear(x, weight, bias, A, B, r, alpha, *, tm=256, tn=512, tk=1024):
    """Convenience wrapper (prep + forward). In real use, call
    prepare_frozen_params once and reuse `prep` across forward calls."""
    prep = prepare_frozen_params(weight, bias, tn=tn, tk=tk)
    return lora_linear_prepared(x, prep, A, B, r, alpha, tm=tm)


if __name__ == "__main__":
    key = jax.random.PRNGKey(0)
    kx, kw, kb, ka, kB = jax.random.split(key, 5)

    # --- Test 1: module-implied small shapes, with bias (single-tile grid) ---
    batch, seq, in_dim, out_dim, r, alpha = 2, 8, 32, 32, 4, 8
    x = jax.random.normal(kx, (batch, seq, in_dim), dtype=jnp.float32)
    weight = jax.random.normal(kw, (out_dim, in_dim), dtype=jnp.float32) * 0.05
    bias = jax.random.normal(kb, (out_dim,), dtype=jnp.float32) * 0.05
    # A: kaiming_normal_(nonlinearity='linear') -> std = 1/sqrt(in_dim).
    A = jax.random.normal(ka, (r, in_dim), dtype=jnp.float32) / jnp.sqrt(in_dim)
    # Module inits B to zeros; use small random values so the LoRA path is
    # exercised numerically (semantics identical).
    B = jax.random.normal(kB, (out_dim, r), dtype=jnp.float32) * 0.05

    out = jax.block_until_ready(lora_linear(x, weight, bias, A, B, r, alpha))
    ref = x @ weight.T + bias + (x @ A.T @ B.T) * (alpha / r)
    assert out.shape == (batch, seq, out_dim)
    assert jnp.allclose(out, ref, atol=1e-4, rtol=1e-4), "mismatch (test 1)"

    # --- Test 2: no bias, small tiles forcing a (2, 3, 2) grid (exercises
    #     K accumulation, parallel j, multiple M tiles) ---
    batch2, seq2, in2, out2, r2, alpha2 = 2, 64, 256, 384, 8, 16
    k2 = jax.random.split(key, 9)
    x2 = jax.random.normal(k2[5], (batch2, seq2, in2), dtype=jnp.float32)
    w2 = jax.random.normal(k2[6], (out2, in2), dtype=jnp.float32) * 0.02
    A2 = jax.random.normal(k2[7], (r2, in2), dtype=jnp.float32) / jnp.sqrt(in2)
    B2 = jax.random.normal(k2[8], (out2, r2), dtype=jnp.float32) * 0.02

    prep2 = prepare_frozen_params(w2, None, tn=128, tk=128)
    out_b = jax.block_until_ready(
        lora_linear_prepared(x2, prep2, A2, B2, r2, alpha2, tm=64))
    ref_b = x2 @ w2.T + (x2 @ A2.T @ B2.T) * (alpha2 / r2)
    assert out_b.shape == (batch2, seq2, out2)
    assert jnp.allclose(out_b, ref_b, atol=1e-4, rtol=1e-4), "mismatch (test 2)"

    # --- Test 3: bf16 compute path (wrapper-normalized dtypes, f32 accumulate) ---
    x3 = x2[:1].astype(jnp.bfloat16)
    prep3 = prepare_frozen_params(w2, None, compute_dtype=jnp.bfloat16)
    out_c = jax.block_until_ready(
        lora_linear_prepared(x3, prep3, A2.astype(jnp.bfloat16),
                             B2.astype(jnp.bfloat16), r2, alpha2))
    x3f = x3.astype(jnp.float32)
    w3f = w2.astype(jnp.bfloat16).astype(jnp.float32)
    A3f = A2.astype(jnp.bfloat16).astype(jnp.float32)
    B3f = B2.astype(jnp.bfloat16).astype(jnp.float32)
    ref_c = x3f @ w3f.T + (x3f @ A3f.T @ B3f.T) * (alpha2 / r2)
    assert out_c.shape == (1, seq2, out2)
    assert jnp.allclose(out_c.astype(jnp.float32), ref_c,
                        atol=5e-2, rtol=5e-2), "mismatch (test 3)"

    print("KERNEL_OK")
</pallas_src>

<mosaic_0001>
module attributes {stable_mosaic.version = 11 : i64} {
  func.func @_lora_kernel(%arg0: i32, %arg1: i32, %arg2: i32, %arg3: memref<16x128xf32, #tpu.memory_space<vmem>>, %arg4: memref<128x128xf32, #tpu.memory_space<vmem>>, %arg5: memref<16x4xf32, #tpu.memory_space<vmem>>, %arg6: memref<4x128xf32, #tpu.memory_space<vmem>>, %arg7: memref<1x128xf32, #tpu.memory_space<vmem>>, %arg8: memref<16x128xf32, #tpu.memory_space<vmem>>, %arg9: memref<16x128xf32, #tpu.memory_space<vmem>>) attributes {dimension_semantics = [#tpu.dimension_semantics<parallel>, #tpu.dimension_semantics<parallel>, #tpu.dimension_semantics<arbitrary>], iteration_bounds = array<i64: 1, 1, 1>, scalar_prefetch = 0 : i64, scratch_operands = 1 : i64, tpu.core_type = #tpu.core_type<tc>, window_params = [{transform_indices = @transform_0, window_bounds = array<i64: 16, 128>}, {transform_indices = @transform_1, window_bounds = array<i64: 128, 128>}, {transform_indices = @transform_2, window_bounds = array<i64: 16, 4>}, {transform_indices = @transform_3, window_bounds = array<i64: 4, 128>}, {transform_indices = @transform_4, window_bounds = array<i64: 1, 128>}, {transform_indices = @transform_5, window_bounds = array<i64: 16, 128>}]} {
    %c0_i32 = arith.constant 0 : i32
    %0 = arith.cmpi eq, %arg2, %c0_i32 : i32
    %1 = arith.extui %0 : i1 to i32
    %c0_i32_0 = arith.constant 0 : i32
    %2 = arith.cmpi ne, %1, %c0_i32_0 : i32
    scf.if %2 {
      %cst_10 = arith.constant 0.000000e+00 : f32
      %12 = vector.broadcast %cst_10 : f32 to vector<16x128xf32>
      %c0_11 = arith.constant 0 : index
      %c0_12 = arith.constant 0 : index
      %13 = vector.load %arg9[%c0_11, %c0_12] : memref<16x128xf32, #tpu.memory_space<vmem>>, vector<16x128xf32>
      tpu.vector_store %arg9[%c0_11, %c0_12], %12 {strides = array<i32>} : memref<16x128xf32, #tpu.memory_space<vmem>>, vector<16x128xf32>,
    } else {
    }
    %c0 = arith.constant 0 : index
    %c0_1 = arith.constant 0 : index
    %3 = vector.load %arg9[%c0, %c0_1] : memref<16x128xf32, #tpu.memory_space<vmem>>, vector<16x128xf32>
    %c0_2 = arith.constant 0 : index
    %c0_3 = arith.constant 0 : index
    %4 = vector.load %arg3[%c0_2, %c0_3] : memref<16x128xf32, #tpu.memory_space<vmem>>, vector<16x128xf32>
    %c0_4 = arith.constant 0 : index
    %c0_5 = arith.constant 0 : index
    %5 = vector.load %arg4[%c0_4, %c0_5] : memref<128x128xf32, #tpu.memory_space<vmem>>, vector<128x128xf32>
    %cst = arith.constant dense<0.000000e+00> : vector<16x128xf32>
    %6 = tpu.matmul %4, %5, %cst {dimension_numbers = #tpu.dot_dimension_numbers<[1], [0], [0], [1], [0, 0, 1, 1], [], []>} : vector<16x128xf32>, vector<128x128xf32>, vector<16x128xf32> -> vector<16x128xf32>
    %7 = arith.addf %3, %6 : vector<16x128xf32>
    %c0_6 = arith.constant 0 : index
    %c0_7 = arith.constant 0 : index
    %8 = vector.load %arg9[%c0_6, %c0_7] : memref<16x128xf32, #tpu.memory_space<vmem>>, vector<16x128xf32>
    tpu.vector_store %arg9[%c0_6, %c0_7], %7 {strides = array<i32>} : memref<16x128xf32, #tpu.memory_space<vmem>>, vector<16x128xf32>,
    %c0_i32_8 = arith.constant 0 : i32
    %9 = arith.cmpi eq, %arg2, %c0_i32_8 : i32
    %10 = arith.extui %9 : i1 to i32
    %c0_i32_9 = arith.constant 0 : i32
    %11 = arith.cmpi ne, %10, %c0_i32_9 : i32
    scf.if %11 {
      %c0_10 = arith.constant 0 : index
      %c0_11 = arith.constant 0 : index
      %12 = vector.load %arg5[%c0_10, %c0_11] : memref<16x4xf32, #tpu.memory_space<vmem>>, vector<16x4xf32>
      %c0_12 = arith.constant 0 : index
      %c0_13 = arith.constant 0 : index
      %13 = vector.load %arg6[%c0_12, %c0_13] : memref<4x128xf32, #tpu.memory_space<vmem>>, vector<4x128xf32>
      %cst_14 = arith.constant dense<0.000000e+00> : vector<16x128xf32>
      %14 = tpu.matmul %12, %13, %cst_14 {dimension_numbers = #tpu.dot_dimension_numbers<[1], [0], [0], [1], [0, 0, 1, 1], [], []>} : vector<16x4xf32>, vector<4x128xf32>, vector<16x128xf32> -> vector<16x128xf32>
      %c0_15 = arith.constant 0 : index
      %c0_16 = arith.constant 0 : index
      %15 = vector.load %arg9[%c0_15, %c0_16] : memref<16x128xf32, #tpu.memory_space<vmem>>, vector<16x128xf32>
      %16 = arith.addf %15, %14 : vector<16x128xf32>
      %c0_17 = arith.constant 0 : index
      %c0_18 = arith.constant 0 : index
      %17 = vector.load %arg7[%c0_17, %c0_18] : memref<1x128xf32, #tpu.memory_space<vmem>>, vector<1x128xf32>
      %18 = vector.broadcast %17 : vector<1x128xf32> to vector<16x128xf32>
      %19 = arith.addf %16, %18 : vector<16x128xf32>
      %c0_19 = arith.constant 0 : index
      %c0_20 = arith.constant 0 : index
      %20 = vector.load %arg8[%c0_19, %c0_20] : memref<16x128xf32, #tpu.memory_space<vmem>>, vector<16x128xf32>
      tpu.vector_store %arg8[%c0_19, %c0_20], %19 {strides = array<i32>} : memref<16x128xf32, #tpu.memory_space<vmem>>, vector<16x128xf32>,
    } else {
    }
    return
  }
  func.func @transform_0(%arg0: i32, %arg1: i32, %arg2: i32) -> (i32, i32) {
    %c0_i32 = arith.constant 0 : i32
    return %arg0, %arg2 : i32, i32
  }
  func.func @transform_1(%arg0: i32, %arg1: i32, %arg2: i32) -> (i32, i32) {
    %c0_i32 = arith.constant 0 : i32
    return %arg2, %arg1 : i32, i32
  }
  func.func @transform_2(%arg0: i32, %arg1: i32, %arg2: i32) -> (i32, i32) {
    %c0_i32 = arith.constant 0 : i32
    %c0_i32_0 = arith.constant 0 : i32
    return %arg0, %c0_i32 : i32, i32
  }
  func.func @transform_3(%arg0: i32, %arg1: i32, %arg2: i32) -> (i32, i32) {
    %c0_i32 = arith.constant 0 : i32
    %c0_i32_0 = arith.constant 0 : i32
    return %c0_i32, %arg1 : i32, i32
  }
  func.func @transform_4(%arg0: i32, %arg1: i32, %arg2: i32) -> (i32, i32) {
    %c0_i32 = arith.constant 0 : i32
    %c0_i32_0 = arith.constant 0 : i32
    return %c0_i32, %arg1 : i32, i32
  }
  func.func @transform_5(%arg0: i32, %arg1: i32, %arg2: i32) -> (i32, i32) {
    %c0_i32 = arith.constant 0 : i32
    return %arg0, %arg1 : i32, i32
  }
}

</mosaic_0001>

<bundles_post_ra>
// kernel: tpu_custom_call.1
= control target key start
LH: loop header
LB: loop body
LE: loop exit
PB: predicated region body
PF: predicated region fallthrough
CT: control target
= control target key end

     0   :  { %10 = vsyncpa [#allocation4], 0  ;;  %s497_s0 = inlined_call_operand.vmem [shape: f32[16,128], index: 0, kind: input, shape index: {}]   ;;  %s498_s1 = inlined_call_operand.hbm [shape: f32[128,128], index: 1, kind: input, shape index: {}]   ;;  %s499_s2 = inlined_call_operand.vmem [shape: f32[16,4], index: 2, kind: input, shape index: {}]   ;;  %s500_s3 = inlined_call_operand.vmem [shape: f32[4,128], index: 3, kind: input, shape index: {}]   ;;  %s501_s4 = inlined_call_operand.vmem [shape: f32[1,128], index: 4, kind: input, shape index: {}]   ;;  %s502_s5 = inlined_call_operand.hbm [shape: f32[16,128], index: 5, kind: output, shape index: {}]  }
   0x1   :  { %11 = vsyncpa [#allocation5], 0  ;;  %s415_s18 = smov [#allocation3]   ;;  %s367_s22 = scalar_lea.hbm %s498_s1, 2048 }
   0x2   :  { %s19_s19 = sshll.u32 %s415_s18, 4  ;;  %p368_p0 = scmp.ne.s32.totalorder %s498_s1, %s367_s22  ;;  %s20_s19 = int_to_ptr.vmem [resolvable:$true] %s19_s19 }
   0x3   :  { %p371_p1 = scmp.lt.u32.totalorder %s367_s22, %s498_s1 }
   0x5   :  { %p373_p2 = pnand %p371_p1, %p368_p0 }
   0x7   :  { %376 = shalt.err (!%p373_p2)
}
   0x8   :  { %s377_s27 = scalar_lea.vmem %s20_s19, 2048  ;;  %p382_p4 = scmp.lt.s32.totalorder %s20_s19, %s20_s19 }
   0x9   :  { %p378_p3 = scmp.ne.s32.totalorder %s20_s19, %s377_s27  ;;  %p383_p5 = scmp.lt.s32.totalorder %s377_s27, %s377_s27 }
   0xb   :  { %p384_p6 = por %p383_p5, %p382_p4 }
   0xd   :  { %p385_p7 = pnand %p384_p6, %p378_p3 }
   0xf   :  { %388 = shalt.err (!%p385_p7)
}
  0x10   :  { %s416_s28 = smov 128   ;;  %s417_s29 = smov 8  }
  0x11   :  { %25 = dma.hbm_to_vmem [thread:$0]  %s498_s1, 2048, %s20_s19, [#allocation4], %s416_s28, %s416_s28, %s417_s29  }
  0x12   :  { %411 = dma.done.wait [#allocation4], 2048  }
  0x13   :  { %412 = vsyncadd [#allocation4], 4294965248  ;;  %v45_v0 = vld [vmem:[#allocation3] sm:$0xff]  ;;  %v46_v1 = vld [vmem:[#allocation3 + $0x8] sm:$0xff]  ;;  %vm153_vm0 = vcmask 1043456   ;;  %vm146_vm1 = vcmask 31744  }
  0x14   :  { %v47_v2 = vld [vmem:[#allocation3 + $0x10] sm:$0xff]  ;;  %v329_v3 = vpack.c.bf16 %v46_v1, %v45_v0  ;;  %v48_v4 = vld [vmem:[#allocation3 + $0x18] sm:$0xff]  ;;  %v49_v6 = vld [vmem:[#allocation3 + $0x20] sm:$0xff]  ;;  %s418_s16 = smov [#allocation6]  }
  0x15   :  { %v333_v5 = vpack.c.bf16 %v48_v4, %v47_v2  ;;  %v50_v7 = vld [vmem:[#allocation3 + $0x28] sm:$0xff]  ;;  %v51_v9 = vld [vmem:[#allocation3 + $0x30] sm:$0xff]  ;;  %v145_v10 = vld [vmem:[%s500_s3] sm:$0xf]  ;;  %s252_s17 = sshll.u32 %s418_s16, 4  ;;  %s253_s17 = int_to_ptr.vmem [resolvable:$true] %s252_s17 }
  0x16   :  { %330 = vmatprep.subr.bf16.mxu1 %v329_v3  ;;  %v337_v8 = vpack.c.bf16 %v50_v7, %v49_v6  ;;  %v143_v11 = vld [vmem:[%s499_s2] sm:$0xff]  ;;  %v52_v12 = vld [vmem:[#allocation3 + $0x38] sm:$0xff]  ;;  %324 = vmatprep.subr.msk.mxu0 %vm153_vm0, %v145_v10  ;;  %v144_v14 = vld [vmem:[%s499_s2 + $0x8] sm:$0xff]  ;;  %s389_s18 = scalar_lea.vmem %s253_s17, 256  ;;  %p394_p9 = scmp.lt.s32.totalorder %s253_s17, %s253_s17 }
  0x17   :  { %332 = vmatpush3.bf16.msra.mxu1 %v329_v3  ;;  %326 = vmatprep.mubr.msk.f32.mxu0 %vm146_vm1, %v143_v11  ;;  %v43_v13 = vld [vmem:[%s497_s0] sm:$0xff]  ;;  %v341_v15 = vpack.c.bf16 %v52_v12, %v51_v9  ;;  %v54_v17 = vld [vmem:[#allocation3 + $0x48] sm:$0xff]  ;;  %v55_v19 = vld [vmem:[#allocation3 + $0x50] sm:$0xff]  ;;  %p390_p8 = scmp.ne.s32.totalorder %s253_s17, %s389_s18  ;;  %p395_p10 = scmp.lt.s32.totalorder %s389_s18, %s389_s18 }
  0x18   :  { %334 = vmatprep.subr.bf16.mxu1 %v333_v5  ;;  %325 = vmatpush3.msk.msra.mxu0 %vm153_vm0, %v145_v10  ;;  %v53_v16 = vld [vmem:[#allocation3 + $0x40] sm:$0xff]  ;;  %v56_v20 = vld [vmem:[#allocation3 + $0x58] sm:$0xff]  ;;  %v58_v23 = vld [vmem:[#allocation3 + $0x68] sm:$0xff] }
  0x19   :  { %321 = vmatprep.mubr.f32.mxu1 %v43_v13  ;;  %327 = vmatmul.mubr.msk.f32.vlgmr.msra.gmra.mrb[0].mxu0 %vm146_vm1, %v144_v14  ;;  %v345_v18 = vpack.c.bf16 %v54_v17, %v53_v16  ;;  %v349_v21 = vpack.c.bf16 %v56_v20, %v55_v19  ;;  %v57_v22 = vld [vmem:[#allocation3 + $0x60] sm:$0xff]  ;;  %v59_v25 = vld [vmem:[#allocation3 + $0x70] sm:$0xff]  ;;  %v60_v26 = vld [vmem:[#allocation3 + $0x78] sm:$0xff]  ;;  %p396_p11 = por %p395_p10, %p394_p9 }
  0x1a   :  { %v353_v24 = vpack.c.bf16 %v58_v23, %v57_v22  ;;  %v357_v27 = vpack.c.bf16 %v60_v26, %v59_v25  ;;  %v44_v28 = vld [vmem:[%s497_s0 + $0x8] sm:$0xff]  ;;  %v267_v32 = vld [vmem:[%s501_s4] ss:$0 sm:$0xff] }
  0x1b   :  { %336 = vmatpush3.bf16.msra.mxu1 %v333_v5  ;;  %p397_p12 = pnand %p396_p11, %p390_p8 }
  0x1c   :  { %338 = vmatprep.subr.bf16.mxu1 %v337_v8 }
  0x1f   :  { %340 = vmatpush3.bf16.msra.mxu1 %v337_v8 }
  0x20   :  { %342 = vmatprep.subr.bf16.mxu1 %v341_v15 }
  0x23   :  { %344 = vmatpush3.bf16.msra.mxu1 %v341_v15 }
  0x24   :  { %346 = vmatprep.subr.bf16.mxu1 %v345_v18 }
  0x27   :  { %348 = vmatpush3.bf16.msra.mxu1 %v345_v18 }
  0x28   :  { %350 = vmatprep.subr.bf16.mxu1 %v349_v21 }
  0x2b   :  { %352 = vmatpush3.bf16.msra.mxu1 %v349_v21 }
  0x2c   :  { %354 = vmatprep.subr.bf16.mxu1 %v353_v24 }
  0x2f   :  { %356 = vmatpush3.bf16.msra.mxu1 %v353_v24 }
  0x30   :  { %358 = vmatprep.subr.bf16.mxu1 %v357_v27 }
  0x33   :  { %360 = vmatpush3.bf16.msra.mxu1 %v357_v27 }
  0x36   :  { %322 = vmatmul.mubr.f32.vlgmr.msra.gmra.mrb[0].mxu1 %v44_v28 }
  0xec   :  { %v328_v29 = vpop.f32.mrb[0].mxu0 }
  0xed   :  { %v223_v30 = vpop.f32.mrb[1].mxu0 }
 0x109   :  { %v323_v31 = vpop.f32.mrb[0].mxu1 }
 0x10a   :  { %v235_v33 = vadd.f32 %v328_v29, %v323_v31  ;;  %v127_v34 = vpop.f32.mrb[1].mxu1 }
 0x10b   :  { %v234_v35 = vadd.f32 %v223_v30, %v127_v34 }
 0x10c   :  { %v244_v36 = vadd.f32 %v267_v32, %v235_v33 }
 0x10d   :  { %v243_v37 = vadd.f32 %v267_v32, %v234_v35 }
 0x10e   :  { %246 = vst [vmem:[#allocation6 + $0x8] sm:$0xff] %v244_v36 }
 0x10f   :  { %245 = vst [vmem:[#allocation6] sm:$0xff] %v243_v37 }
 0x110   :  { %400 = shalt.err (!%p397_p12)
}
 0x111   :  { %s401_s4 = scalar_lea.hbm %s502_s5, 256 }
 0x112   :  { %p402_p13 = scmp.ne.s32.totalorder %s502_s5, %s401_s4  ;;  %p405_p0 = scmp.lt.u32.totalorder %s401_s4, %s502_s5 }
 0x114   :  { %p407_p1 = pnand %p405_p0, %p402_p13 }
 0x116   :  { %410 = shalt.err (!%p407_p1)
}
 0x117   :  { %258 = dma.vmem_to_hbm [thread:$0]  %s253_s17, 256, %s502_s5, [#allocation5], %s416_s28, %s416_s28, %s417_s29  }
 0x118   :  { %413 = dma.done.wait [#allocation5], 256  }
 0x119   :  { %414 = vsyncadd [#allocation5], 4294967040 }
 0x11a   :  { %262 = vsyncpa [#allocation4], 1 }
 0x11b   :  { %263 = vsyncpa [#allocation5], 1 }

</bundles_post_ra>
